<compile_context>
chip_gen: v5e
topology: v5e:2x2
jax: 0.10.0
libtpu: 0.0.40
codegen_flags: <defaults>
</compile_context>

<pallas_src>
import functools

import jax
import jax.numpy as jnp
import numpy as np
from jax.experimental import pallas as pl
from jax.experimental.pallas import tpu as pltpu


def _dino_loss_kernel(params_ref,            # SMEM (4,) f32: [1/student_T, 1/teacher_T, pad, pad]
                      teacher_ref,           # (Vt, TB, D) input dtype
                      student_ref,           # (1,  TB, D) input dtype
                      center_ref,            # (1, D) f32 (old center)
                      loss_part_ref,         # (1, 8, 128) f32 per-tile partial (broadcast accumulator)
                      center_part_ref,       # (1, 8, D)  f32 per-tile teacher row-sum (x8 broadcast)
                      q_cache,               # VMEM (Vt, TB, D) f32 scratch
                      q_sum,                 # VMEM (TB, D) f32 scratch: sum of all teacher q
                      *, n_teacher_views):
    iv = pl.program_id(1)                    # student view index (inner, "arbitrary")

    inv_student_temp = params_ref[0]
    inv_teacher_temp = params_ref[1]

    # ---- teacher phase: once per batch tile (iv == 0), never per pair -------
    @pl.when(iv == 0)
    def _teacher_phase():
        loss_part_ref[...] = jnp.zeros_like(loss_part_ref)
        c = center_ref[...]                                       # (1, D)
        for it in range(n_teacher_views):                         # static unroll, Vt small
            t = teacher_ref[it].astype(jnp.float32)               # (TB, D)
            # Raw row-sum for the center EMA, broadcast across 8 sublanes so the
            # output block is fully (and lane/sublane-densely) written; the
            # wrapper divides the extra factor of 8 back out.
            row_sum = jnp.broadcast_to(
                jnp.sum(t, axis=0, keepdims=True), center_part_ref.shape[1:])
            z = (t - c) * inv_teacher_temp
            z = z - jnp.max(z, axis=-1, keepdims=True)
            ez = jnp.exp(z)
            # Denominator is only (TB, 1): exact reciprocal is negligible work.
            q = ez * pl.reciprocal(jnp.sum(ez, axis=-1, keepdims=True), approx=False)
            q_cache[it] = q
            if it == 0:
                center_part_ref[0] = row_sum
                q_sum[...] = q
            else:
                center_part_ref[0] += row_sum
                q_sum[...] += q

    # ---- student phase: log-softmax computed once per (view, tile) ----------
    s = student_ref[0].astype(jnp.float32) * inv_student_temp     # (TB, D)
    s = s - jnp.max(s, axis=-1, keepdims=True)
    lse = jnp.log(jnp.sum(jnp.exp(s), axis=-1, keepdims=True))
    logp = s - lse

    # Single contraction against the summed teacher distribution (covers every
    # teacher view at once); the scalar result is broadcast-accumulated into
    # the lane-dense (8,128) partial block (unmasked stores).
    loss_part_ref[...] += -jnp.sum(q_sum[...] * logp)

    # Diagonal correction: remove the (it == iv) pair that PyTorch skips.
    for it in range(n_teacher_views):                             # static unroll
        @pl.when(iv == it)
        def _diag(it=it):
            loss_part_ref[...] += jnp.sum(q_cache[it] * logp)


def _vmem_capacity_bytes() -> int:
    """Per-TensorCore VMEM capacity; conservative fallback if the query fails."""
    try:
        return int(pltpu.get_tpu_info().vmem_capacity_bytes)
    except Exception:
        return 64 * 1024 * 1024            # v7x-sized fallback (smallest current part)


def _footprint(tb, d, vt, itemsize):
    """Modeled resident VMEM bytes for a batch tile of `tb` rows.

    Includes double-buffered teacher/student input blocks, the f32 q_cache and
    q_sum scratches, an allowance of ~8 f32 rows for the softmax/log-softmax
    elementwise intermediates, and the (small) center / output blocks."""
    per_row = d * ((2 * vt + 2) * itemsize        # teacher + student blocks, 2 buffers each
                   + 4 * (vt + 1)                 # q_cache + q_sum (f32)
                   + 8 * 4)                       # f32 elementwise intermediates
    fixed = 72 * d + (16 << 10)                   # center in + (8,D) center out + loss out
    return tb * per_row + fixed


def _pick_block_batch(batch_padded, d, vt, itemsize, budget_bytes):
    """Largest batch tile (multiple of 8 dividing batch_padded) fitting the budget."""
    candidates = [t for t in range(8, batch_padded + 1, 8) if batch_padded % t == 0]
    for tile in reversed(candidates):
        if _footprint(tile, d, vt, itemsize) <= budget_bytes:
            return tile
    return candidates[0]


def dino_loss_pallas(teacher, student, center, *,
                     student_temp, teacher_temp, center_momentum,
                     block_batch=None):
    """teacher: (Vt, B, D), student: (Vs, B, D) in any float dtype (upcast
    in-kernel); center: (1, D) f32.  Returns (scalar f32 loss, new (1, D) center)."""
    vt, b, d = teacher.shape
    vs, bs, ds = student.shape
    assert (b, d) == (bs, ds) and center.shape == (1, d)
    center = center.astype(jnp.float32)

    n_loss_terms = vt * vs - min(vt, vs)

    # Pad the batch to a multiple of 8 so the (8,128) block constraint holds for
    # any B; zero-padded rows contribute exactly n_loss_terms*log(D) each to the
    # raw loss sum (uniform student log-softmax against a normalized teacher q),
    # which is subtracted analytically below.  Center sums are unaffected.
    b_pad = ((b + 7) // 8) * 8
    n_pad = b_pad - b
    if n_pad:
        teacher = jnp.pad(teacher, ((0, 0), (0, n_pad), (0, 0)))
        student = jnp.pad(student, ((0, 0), (0, n_pad), (0, 0)))

    itemsize = max(teacher.dtype.itemsize, student.dtype.itemsize)

    # Generation-aware VMEM budgeting: ~48 MiB usable on v7x (64 MiB physical),
    # ~96 MiB on v5e/v6e (128 MiB physical); leave headroom for compiler scratch.
    vmem_cap = _vmem_capacity_bytes()
    vmem_cap_limit = max(min(int(0.75 * vmem_cap), vmem_cap - (16 << 20)), 16 << 20)
    budget = max(vmem_cap_limit - (4 << 20), 8 << 20)

    tb = block_batch if block_batch is not None else _pick_block_batch(
        b_pad, d, vt, itemsize, budget)
    assert b_pad % tb == 0, "block_batch must divide the (padded) batch size"
    nb = b_pad // tb

    resident = _footprint(tb, d, vt, itemsize)
    vmem_limit = None
    if resident > (12 << 20):       # default scoped limit (16 MiB on v5e) may not suffice
        vmem_limit = int(min(max(resident + (8 << 20), 32 << 20), vmem_cap_limit))

    params = jnp.array([1.0 / student_temp, 1.0 / teacher_temp, 0.0, 0.0], jnp.float32)

    kernel = functools.partial(_dino_loss_kernel, n_teacher_views=vt)

    cost = pl.CostEstimate(
        flops=int((7 * vt + 7 * vs + 2 * min(vt, vs)) * b_pad * d),
        transcendentals=int((vt + vs) * b_pad * d),
        bytes_accessed=int(vt * b_pad * d * teacher.dtype.itemsize
                           + vs * b_pad * d * student.dtype.itemsize
                           + (8 * nb + 1) * d * 4 + nb * 8 * 128 * 4))

    # TODO(synk): optional per-chip tuning (pl.Buffered(1) on the teacher block
    # for v7x, pl.Buffered(3) on the student block for v5e) left at defaults.
    loss_part, center_part = pl.pallas_call(
        kernel,
        out_shape=(
            jax.ShapeDtypeStruct((nb, 8, 128), jnp.float32),   # per-tile loss partial (broadcast)
            jax.ShapeDtypeStruct((nb, 8, d), jnp.float32),     # per-tile teacher sum (x8 broadcast)
        ),
        grid_spec=pltpu.PrefetchScalarGridSpec(
            num_scalar_prefetch=0,
            grid=(nb, vs),
            in_specs=[
                pl.BlockSpec(memory_space=pltpu.MemorySpace.SMEM),        # runtime scalars
                pl.BlockSpec((vt, tb, d), lambda bi, iv: (0, bi, 0)),     # all teacher views, 1 B-tile
                pl.BlockSpec((1, tb, d), lambda bi, iv: (iv, bi, 0)),     # student view iv, 1 B-tile
                pl.BlockSpec((1, d), lambda bi, iv: (0, 0)),              # old center
            ],
            out_specs=[
                pl.BlockSpec((1, 8, 128), lambda bi, iv: (bi, 0, 0)),
                pl.BlockSpec((1, 8, d), lambda bi, iv: (bi, 0, 0)),
            ],
            scratch_shapes=[
                pltpu.VMEM((vt, tb, d), jnp.float32),      # cached per-view teacher softmax q
                pltpu.VMEM((tb, d), jnp.float32),          # q_sum = sum_it q[it]
            ],
        ),
        compiler_params=pltpu.CompilerParams(
            dimension_semantics=("parallel", "arbitrary"),   # megacore over batch tiles (v7x)
            vmem_limit_bytes=vmem_limit,
        ),
        cost_estimate=cost,
    )(params, teacher, student, center)

    # ---- tiny wrapper-side finalize (works with the parallel batch axis) -----
    loss_sum = jnp.sum(loss_part[:, 0, 0])
    if n_pad:
        loss_sum = loss_sum - jnp.float32(n_pad * n_loss_terms) * jnp.log(jnp.float32(d))
    loss = loss_sum / jnp.float32(b * n_loss_terms)

    # center_part holds the raw teacher row-sum broadcast across 8 sublanes.
    batch_center = (jnp.sum(center_part, axis=(0, 1)) / jnp.float32(8 * vt * b)).reshape(1, d)
    new_center = center * center_momentum + batch_center * (1.0 - center_momentum)
    return loss, new_center


class DINOLossPallas:
    """JAX/Pallas re-implementation of the PyTorch DINOLoss module.

    The kernel is compiled once per shape/dtype; the epoch-dependent teacher
    temperature flows in at runtime through SMEM, so warmup epochs never
    recompile.  The center EMA (single-device version of the all-reduced
    PyTorch update) is applied in the wrapper."""

    def __init__(self, output_dim: int,
                 teacher_start_temp: float = 0.04,
                 teacher_temp: float = 0.07,
                 teacher_temp_warmup_epochs: int = 30,
                 student_temp: float = 0.1,
                 center_momentum: float = 0.9,
                 block_batch=None):
        self.output_dim = output_dim
        self.teacher_start_temp = teacher_start_temp
        self.teacher_temp = teacher_temp
        self.teacher_temp_warmup_epochs = teacher_temp_warmup_epochs
        self.student_temp = student_temp
        self.center_momentum = center_momentum
        self.block_batch = block_batch
        # register_buffer('center', zeros(1, output_dim))
        self.center = jnp.zeros((1, output_dim), jnp.float32)

    def _teacher_temp(self, current_epoch: int) -> float:
        if current_epoch < self.teacher_temp_warmup_epochs:
            progress = current_epoch / self.teacher_temp_warmup_epochs
            return self.teacher_start_temp + (self.teacher_temp - self.teacher_start_temp) * progress
        return self.teacher_temp

    def __call__(self, branches_outputs, epoch: int):
        student_output, teacher_output = branches_outputs
        student = jnp.stack(student_output)     # (Vs, B, D), kept in native dtype
        teacher = jnp.stack(teacher_output)     # (Vt, B, D)
        loss, new_center = dino_loss_pallas(
            teacher, student, self.center,
            student_temp=self.student_temp,
            teacher_temp=self._teacher_temp(epoch),
            center_momentum=self.center_momentum,
            block_batch=self.block_batch)
        # TODO(synk): under jit/scan training loops thread `new_center`
        # functionally instead of mutating the Python object.
        self.center = new_center
        return loss


def _reference_dino_loss(student_list, teacher_list, center, epoch, module):
    """Pure-jnp reference mirroring the PyTorch forward."""
    student = jnp.stack(student_list).astype(jnp.float32) / module.student_temp
    temp = module._teacher_temp(epoch)
    teacher = jnp.stack(teacher_list).astype(jnp.float32)
    q_all = jax.nn.softmax((teacher - center) / temp, axis=-1)
    total, n = 0.0, 0
    for it in range(teacher.shape[0]):
        for iv in range(student.shape[0]):
            if iv == it:
                continue
            logp = jax.nn.log_softmax(student[iv], axis=-1)
            loss = jnp.sum(-q_all[it] * logp, axis=-1)
            total = total + jnp.mean(loss)
            n += 1
    total = total / n
    cat = jnp.concatenate([t.astype(jnp.float32) for t in teacher_list], axis=0)
    batch_center = jnp.sum(cat, axis=0, keepdims=True) / cat.shape[0]
    new_center = center * module.center_momentum + batch_center * (1 - module.center_momentum)
    return total, new_center


if __name__ == "__main__":
    # --- Test 1: 2 teacher views, 3 student views, batch=16, dim=256, 2 tiles.
    B, D = 16, 256
    VT, VS = 2, 3
    key = jax.random.PRNGKey(0)
    ks = jax.random.split(key, VT + VS)
    teacher_views = [jax.random.normal(ks[i], (B, D), jnp.float32) for i in range(VT)]
    student_views = [jax.random.normal(ks[VT + i], (B, D), jnp.float32) for i in range(VS)]

    module = DINOLossPallas(output_dim=D, teacher_start_temp=0.04, teacher_temp=0.07,
                            teacher_temp_warmup_epochs=30, student_temp=0.1,
                            center_momentum=0.9,
                            block_batch=8)          # 2 batch tiles -> exercises the parallel axis

    center0 = module.center
    loss5 = jax.block_until_ready(module([student_views, teacher_views], 5))
    center5 = jax.block_until_ready(module.center)
    ref_loss5, ref_center5 = _reference_dino_loss(student_views, teacher_views, center0, 5, module)
    assert np.allclose(np.asarray(loss5), np.asarray(ref_loss5), rtol=1e-4, atol=1e-4), (loss5, ref_loss5)
    assert np.allclose(np.asarray(center5), np.asarray(ref_center5), rtol=1e-4, atol=1e-4)

    # Epoch 40 (past warmup) — different temperature flows through SMEM with the
    # updated center, reusing the same compiled kernel.
    loss40 = jax.block_until_ready(module([student_views, teacher_views], 40))
    center40 = jax.block_until_ready(module.center)
    ref_loss40, ref_center40 = _reference_dino_loss(student_views, teacher_views, center5, 40, module)
    assert np.allclose(np.asarray(loss40), np.asarray(ref_loss40), rtol=1e-4, atol=1e-4), (loss40, ref_loss40)
    assert np.allclose(np.asarray(center40), np.asarray(ref_center40), rtol=1e-4, atol=1e-4)

    # --- Test 2: batch not a multiple of 8 (exercises the padding path).
    B2, D2, VT2, VS2 = 12, 128, 2, 2
    ks2 = jax.random.split(jax.random.PRNGKey(1), VT2 + VS2)
    teacher2 = [jax.random.normal(ks2[i], (B2, D2), jnp.float32) for i in range(VT2)]
    student2 = [jax.random.normal(ks2[VT2 + i], (B2, D2), jnp.float32) for i in range(VS2)]
    module2 = DINOLossPallas(output_dim=D2, student_temp=0.1, center_momentum=0.9)
    c0 = module2.center
    loss_p = jax.block_until_ready(module2([student2, teacher2], 3))
    ref_lp, ref_cp = _reference_dino_loss(student2, teacher2, c0, 3, module2)
    assert np.allclose(np.asarray(loss_p), np.asarray(ref_lp), rtol=1e-4, atol=1e-4), (loss_p, ref_lp)
    assert np.allclose(np.asarray(module2.center), np.asarray(ref_cp), rtol=1e-4, atol=1e-4)

    print("KERNEL_OK")
</pallas_src>

<mosaic_0001>
module attributes {stable_mosaic.version = 11 : i64} {
  func.func @_dino_loss_kernel(%arg0: i32, %arg1: i32, %arg2: memref<4xf32, #tpu.memory_space<smem>>, %arg3: memref<2x8x256xf32, #tpu.memory_space<vmem>>, %arg4: memref<1x8x256xf32, #tpu.memory_space<vmem>>, %arg5: memref<1x256xf32, #tpu.memory_space<vmem>>, %arg6: memref<1x8x128xf32, #tpu.memory_space<vmem>>, %arg7: memref<1x8x256xf32, #tpu.memory_space<vmem>>, %arg8: memref<2x8x256xf32, #tpu.memory_space<vmem>>, %arg9: memref<8x256xf32, #tpu.memory_space<vmem>>) attributes {dimension_semantics = [#tpu.dimension_semantics<parallel>, #tpu.dimension_semantics<arbitrary>], iteration_bounds = array<i64: 2, 3>, scalar_prefetch = 0 : i64, scratch_operands = 2 : i64, tpu.core_type = #tpu.core_type<tc>, window_params = [{transform_indices = @transform_0, window_bounds = array<i64: 4>}, {transform_indices = @transform_1, window_bounds = array<i64: 2, 8, 256>}, {transform_indices = @transform_2, window_bounds = array<i64: 1, 8, 256>}, {pipeline_mode = #tpu.pipeline_mode<synchronous>, transform_indices = @transform_3, window_bounds = array<i64: 1, 256>}, {transform_indices = @transform_4, window_bounds = array<i64: 1, 8, 128>}, {transform_indices = @transform_5, window_bounds = array<i64: 1, 8, 256>}]} {
    %c0 = arith.constant 0 : index
    %0 = memref.load %arg2[%c0] : memref<4xf32, #tpu.memory_space<smem>>
    %c1 = arith.constant 1 : index
    %1 = memref.load %arg2[%c1] : memref<4xf32, #tpu.memory_space<smem>>
    %c0_i32 = arith.constant 0 : i32
    %2 = arith.cmpi eq, %arg1, %c0_i32 : i32
    %3 = arith.extui %2 : i1 to i32
    %c0_i32_0 = arith.constant 0 : i32
    %4 = arith.cmpi ne, %3, %c0_i32_0 : i32
    scf.if %4 {
      %cst_18 = arith.constant 0.000000e+00 : f32
      %36 = vector.broadcast %cst_18 : f32 to vector<1x8x128xf32>
      %c0_19 = arith.constant 0 : index
      %c0_20 = arith.constant 0 : index
      %c0_21 = arith.constant 0 : index
      %37 = vector.load %arg6[%c0_19, %c0_20, %c0_21] : memref<1x8x128xf32, #tpu.memory_space<vmem>>, vector<1x8x128xf32>
      tpu.vector_store %arg6[%c0_19, %c0_20, %c0_21], %36 {strides = array<i32>} : memref<1x8x128xf32, #tpu.memory_space<vmem>>, vector<1x8x128xf32>,
      %c0_22 = arith.constant 0 : index
      %c0_23 = arith.constant 0 : index
      %38 = vector.load %arg5[%c0_22, %c0_23] : memref<1x256xf32, #tpu.memory_space<vmem>>, vector<1x256xf32>
      %c0_24 = arith.constant 0 : index
      %c0_25 = arith.constant 0 : index
      %c0_26 = arith.constant 0 : index
      %39 = vector.load %arg3[%c0_24, %c0_25, %c0_26] : memref<2x8x256xf32, #tpu.memory_space<vmem>>, vector<1x8x256xf32>
      %40 = vector.shape_cast %39 : vector<1x8x256xf32> to vector<8x256xf32>
      %cst_27 = arith.constant dense<0.000000e+00> : vector<256xf32>
      %41 = vector.multi_reduction <add>, %40, %cst_27 [0] : vector<8x256xf32> to vector<256xf32>
      %42 = vector.shape_cast %41 : vector<256xf32> to vector<1x256xf32>
      %43 = vector.shape_cast %42 : vector<1x256xf32> to vector<1x256xf32>
      %44 = vector.broadcast %43 : vector<1x256xf32> to vector<8x256xf32>
      %45 = vector.broadcast %38 : vector<1x256xf32> to vector<8x256xf32>
      %46 = arith.subf %40, %45 : vector<8x256xf32>
      %47 = vector.broadcast %1 : f32 to vector<8x256xf32>
      %48 = arith.mulf %46, %47 : vector<8x256xf32>
      %cst_28 = arith.constant dense<0xFF800000> : vector<8xf32>
      %49 = vector.multi_reduction <maximumf>, %48, %cst_28 [1] : vector<8x256xf32> to vector<8xf32>
      %50 = vector.shape_cast %49 : vector<8xf32> to vector<8x1xf32>
      %51 = vector.broadcast %50 : vector<8x1xf32> to vector<8x256xf32>
      %52 = arith.subf %48, %51 : vector<8x256xf32>
      %53 = math.exp %52 : vector<8x256xf32>
      %cst_29 = arith.constant dense<0.000000e+00> : vector<8xf32>
      %54 = vector.multi_reduction <add>, %53, %cst_29 [1] : vector<8x256xf32> to vector<8xf32>
      %55 = vector.shape_cast %54 : vector<8xf32> to vector<8x1xf32>
      %56 = tpu.reciprocal %55 : vector<8x1xf32> -> vector<8x1xf32>
      %57 = vector.broadcast %56 : vector<8x1xf32> to vector<8x256xf32>
      %58 = arith.mulf %53, %57 : vector<8x256xf32>
      %c0_30 = arith.constant 0 : index
      %c0_31 = arith.constant 0 : index
      %c0_32 = arith.constant 0 : index
      %59 = vector.load %arg8[%c0_30, %c0_31, %c0_32] : memref<2x8x256xf32, #tpu.memory_space<vmem>>, vector<1x8x256xf32>
      %60 = vector.shape_cast %59 : vector<1x8x256xf32> to vector<8x256xf32>
      %61 = vector.shape_cast %58 : vector<8x256xf32> to vector<1x8x256xf32>
      tpu.vector_store %arg8[%c0_30, %c0_31, %c0_32], %61 {strides = array<i32>} : memref<2x8x256xf32, #tpu.memory_space<vmem>>, vector<1x8x256xf32>,
      %c0_33 = arith.constant 0 : index
      %c0_34 = arith.constant 0 : index
      %c0_35 = arith.constant 0 : index
      %62 = vector.load %arg7[%c0_33, %c0_34, %c0_35] : memref<1x8x256xf32, #tpu.memory_space<vmem>>, vector<1x8x256xf32>
      %63 = vector.shape_cast %62 : vector<1x8x256xf32> to vector<8x256xf32>
      %64 = vector.shape_cast %44 : vector<8x256xf32> to vector<1x8x256xf32>
      tpu.vector_store %arg7[%c0_33, %c0_34, %c0_35], %64 {strides = array<i32>} : memref<1x8x256xf32, #tpu.memory_space<vmem>>, vector<1x8x256xf32>,
      %c0_36 = arith.constant 0 : index
      %c0_37 = arith.constant 0 : index
      %65 = vector.load %arg9[%c0_36, %c0_37] : memref<8x256xf32, #tpu.memory_space<vmem>>, vector<8x256xf32>
      tpu.vector_store %arg9[%c0_36, %c0_37], %58 {strides = array<i32>} : memref<8x256xf32, #tpu.memory_space<vmem>>, vector<8x256xf32>,
      %c1_38 = arith.constant 1 : index
      %c0_39 = arith.constant 0 : index
      %c0_40 = arith.constant 0 : index
      %66 = vector.load %arg3[%c1_38, %c0_39, %c0_40] : memref<2x8x256xf32, #tpu.memory_space<vmem>>, vector<1x8x256xf32>
      %67 = vector.shape_cast %66 : vector<1x8x256xf32> to vector<8x256xf32>
      %cst_41 = arith.constant dense<0.000000e+00> : vector<256xf32>
      %68 = vector.multi_reduction <add>, %67, %cst_41 [0] : vector<8x256xf32> to vector<256xf32>
      %69 = vector.shape_cast %68 : vector<256xf32> to vector<1x256xf32>
      %70 = vector.shape_cast %69 : vector<1x256xf32> to vector<1x256xf32>
      %71 = vector.broadcast %70 : vector<1x256xf32> to vector<8x256xf32>
      %72 = vector.broadcast %38 : vector<1x256xf32> to vector<8x256xf32>
      %73 = arith.subf %67, %72 : vector<8x256xf32>
      %74 = vector.broadcast %1 : f32 to vector<8x256xf32>
      %75 = arith.mulf %73, %74 : vector<8x256xf32>
      %cst_42 = arith.constant dense<0xFF800000> : vector<8xf32>
      %76 = vector.multi_reduction <maximumf>, %75, %cst_42 [1] : vector<8x256xf32> to vector<8xf32>
      %77 = vector.shape_cast %76 : vector<8xf32> to vector<8x1xf32>
      %78 = vector.broadcast %77 : vector<8x1xf32> to vector<8x256xf32>
      %79 = arith.subf %75, %78 : vector<8x256xf32>
      %80 = math.exp %79 : vector<8x256xf32>
      %cst_43 = arith.constant dense<0.000000e+00> : vector<8xf32>
      %81 = vector.multi_reduction <add>, %80, %cst_43 [1] : vector<8x256xf32> to vector<8xf32>
      %82 = vector.shape_cast %81 : vector<8xf32> to vector<8x1xf32>
      %83 = tpu.reciprocal %82 : vector<8x1xf32> -> vector<8x1xf32>
      %84 = vector.broadcast %83 : vector<8x1xf32> to vector<8x256xf32>
      %85 = arith.mulf %80, %84 : vector<8x256xf32>
      %c1_44 = arith.constant 1 : index
      %c0_45 = arith.constant 0 : index
      %c0_46 = arith.constant 0 : index
      %86 = vector.load %arg8[%c1_44, %c0_45, %c0_46] : memref<2x8x256xf32, #tpu.memory_space<vmem>>, vector<1x8x256xf32>
      %87 = vector.shape_cast %86 : vector<1x8x256xf32> to vector<8x256xf32>
      %88 = vector.shape_cast %85 : vector<8x256xf32> to vector<1x8x256xf32>
      tpu.vector_store %arg8[%c1_44, %c0_45, %c0_46], %88 {strides = array<i32>} : memref<2x8x256xf32, #tpu.memory_space<vmem>>, vector<1x8x256xf32>,
      %c0_47 = arith.constant 0 : index
      %c0_48 = arith.constant 0 : index
      %c0_49 = arith.constant 0 : index
      %89 = vector.load %arg7[%c0_47, %c0_48, %c0_49] : memref<1x8x256xf32, #tpu.memory_space<vmem>>, vector<1x8x256xf32>
      %90 = vector.shape_cast %89 : vector<1x8x256xf32> to vector<8x256xf32>
      %91 = arith.addf %90, %71 : vector<8x256xf32>
      %c0_50 = arith.constant 0 : index
      %c0_51 = arith.constant 0 : index
      %c0_52 = arith.constant 0 : index
      %92 = vector.load %arg7[%c0_50, %c0_51, %c0_52] : memref<1x8x256xf32, #tpu.memory_space<vmem>>, vector<1x8x256xf32>
      %93 = vector.shape_cast %92 : vector<1x8x256xf32> to vector<8x256xf32>
      %94 = vector.shape_cast %91 : vector<8x256xf32> to vector<1x8x256xf32>
      tpu.vector_store %arg7[%c0_50, %c0_51, %c0_52], %94 {strides = array<i32>} : memref<1x8x256xf32, #tpu.memory_space<vmem>>, vector<1x8x256xf32>,
      %c0_53 = arith.constant 0 : index
      %c0_54 = arith.constant 0 : index
      %95 = vector.load %arg9[%c0_53, %c0_54] : memref<8x256xf32, #tpu.memory_space<vmem>>, vector<8x256xf32>
      %96 = arith.addf %95, %85 : vector<8x256xf32>
      %c0_55 = arith.constant 0 : index
      %c0_56 = arith.constant 0 : index
      %97 = vector.load %arg9[%c0_55, %c0_56] : memref<8x256xf32, #tpu.memory_space<vmem>>, vector<8x256xf32>
      tpu.vector_store %arg9[%c0_55, %c0_56], %96 {strides = array<i32>} : memref<8x256xf32, #tpu.memory_space<vmem>>, vector<8x256xf32>,
    } else {
    }
    %c0_1 = arith.constant 0 : index
    %c0_2 = arith.constant 0 : index
    %c0_3 = arith.constant 0 : index
    %5 = vector.load %arg4[%c0_1, %c0_2, %c0_3] : memref<1x8x256xf32, #tpu.memory_space<vmem>>, vector<1x8x256xf32>
    %6 = vector.shape_cast %5 : vector<1x8x256xf32> to vector<8x256xf32>
    %7 = vector.broadcast %0 : f32 to vector<8x256xf32>
    %8 = arith.mulf %6, %7 : vector<8x256xf32>
    %cst = arith.constant dense<0xFF800000> : vector<8xf32>
    %9 = vector.multi_reduction <maximumf>, %8, %cst [1] : vector<8x256xf32> to vector<8xf32>
    %10 = vector.shape_cast %9 : vector<8xf32> to vector<8x1xf32>
    %11 = vector.broadcast %10 : vector<8x1xf32> to vector<8x256xf32>
    %12 = arith.subf %8, %11 : vector<8x256xf32>
    %13 = math.exp %12 : vector<8x256xf32>
    %cst_4 = arith.constant dense<0.000000e+00> : vector<8xf32>
    %14 = vector.multi_reduction <add>, %13, %cst_4 [1] : vector<8x256xf32> to vector<8xf32>
    %15 = vector.shape_cast %14 : vector<8xf32> to vector<8x1xf32>
    %16 = math.log %15 : vector<8x1xf32>
    %17 = vector.broadcast %16 : vector<8x1xf32> to vector<8x256xf32>
    %18 = arith.subf %12, %17 : vector<8x256xf32>
    %c0_5 = arith.constant 0 : index
    %c0_6 = arith.constant 0 : index
    %c0_7 = arith.constant 0 : index
    %19 = vector.load %arg6[%c0_5, %c0_6, %c0_7] : memref<1x8x128xf32, #tpu.memory_space<vmem>>, vector<1x8x128xf32>
    %c0_8 = arith.constant 0 : index
    %c0_9 = arith.constant 0 : index
    %20 = vector.load %arg9[%c0_8, %c0_9] : memref<8x256xf32, #tpu.memory_space<vmem>>, vector<8x256xf32>
    %21 = arith.mulf %20, %18 : vector<8x256xf32>
    %22 = vector.shape_cast %21 : vector<8x256xf32> to vector<1x8x256xf32>
    %cst_10 = arith.constant dense<0.000000e+00> : vector<1xf32>
    %23 = vector.multi_reduction <add>, %22, %cst_10 [1, 2] : vector<1x8x256xf32> to vector<1xf32>
    %24 = vector.shape_cast %23 : vector<1xf32> to vector<1x1x1xf32>
    %25 = vector.extract %24[0, 0, 0] : f32 from vector<1x1x1xf32>
    %cst_11 = arith.constant 0.000000e+00 : f32
    %26 = arith.subf %cst_11, %25 : f32
    %27 = vector.broadcast %26 : f32 to vector<1x8x128xf32>
    %28 = arith.addf %19, %27 : vector<1x8x128xf32>
    %c0_12 = arith.constant 0 : index
    %c0_13 = arith.constant 0 : index
    %c0_14 = arith.constant 0 : index
    %29 = vector.load %arg6[%c0_12, %c0_13, %c0_14] : memref<1x8x128xf32, #tpu.memory_space<vmem>>, vector<1x8x128xf32>
    tpu.vector_store %arg6[%c0_12, %c0_13, %c0_14], %28 {strides = array<i32>} : memref<1x8x128xf32, #tpu.memory_space<vmem>>, vector<1x8x128xf32>,
    %c0_i32_15 = arith.constant 0 : i32
    %30 = arith.cmpi eq, %arg1, %c0_i32_15 : i32
    %31 = arith.extui %30 : i1 to i32
    %c0_i32_16 = arith.constant 0 : i32
    %32 = arith.cmpi ne, %31, %c0_i32_16 : i32
    scf.if %32 {
      %c0_18 = arith.constant 0 : index
      %c0_19 = arith.constant 0 : index
      %c0_20 = arith.constant 0 : index
      %36 = vector.load %arg6[%c0_18, %c0_19, %c0_20] : memref<1x8x128xf32, #tpu.memory_space<vmem>>, vector<1x8x128xf32>
      %c0_21 = arith.constant 0 : index
      %c0_22 = arith.constant 0 : index
      %c0_23 = arith.constant 0 : index
      %37 = vector.load %arg8[%c0_21, %c0_22, %c0_23] : memref<2x8x256xf32, #tpu.memory_space<vmem>>, vector<1x8x256xf32>
      %38 = vector.shape_cast %37 : vector<1x8x256xf32> to vector<8x256xf32>
      %39 = arith.mulf %38, %18 : vector<8x256xf32>
      %40 = vector.shape_cast %39 : vector<8x256xf32> to vector<1x8x256xf32>
      %cst_24 = arith.constant dense<0.000000e+00> : vector<1xf32>
      %41 = vector.multi_reduction <add>, %40, %cst_24 [1, 2] : vector<1x8x256xf32> to vector<1xf32>
      %42 = vector.shape_cast %41 : vector<1xf32> to vector<1x1x1xf32>
      %43 = vector.extract %42[0, 0, 0] : f32 from vector<1x1x1xf32>
      %44 = vector.broadcast %43 : f32 to vector<1x8x128xf32>
      %45 = arith.addf %36, %44 : vector<1x8x128xf32>
      %c0_25 = arith.constant 0 : index
      %c0_26 = arith.constant 0 : index
      %c0_27 = arith.constant 0 : index
      %46 = vector.load %arg6[%c0_25, %c0_26, %c0_27] : memref<1x8x128xf32, #tpu.memory_space<vmem>>, vector<1x8x128xf32>
      tpu.vector_store %arg6[%c0_25, %c0_26, %c0_27], %45 {strides = array<i32>} : memref<1x8x128xf32, #tpu.memory_space<vmem>>, vector<1x8x128xf32>,
    } else {
    }
    %c1_i32 = arith.constant 1 : i32
    %33 = arith.cmpi eq, %arg1, %c1_i32 : i32
    %34 = arith.extui %33 : i1 to i32
    %c0_i32_17 = arith.constant 0 : i32
    %35 = arith.cmpi ne, %34, %c0_i32_17 : i32
    scf.if %35 {
      %c0_18 = arith.constant 0 : index
      %c0_19 = arith.constant 0 : index
      %c0_20 = arith.constant 0 : index
      %36 = vector.load %arg6[%c0_18, %c0_19, %c0_20] : memref<1x8x128xf32, #tpu.memory_space<vmem>>, vector<1x8x128xf32>
      %c1_21 = arith.constant 1 : index
      %c0_22 = arith.constant 0 : index
      %c0_23 = arith.constant 0 : index
      %37 = vector.load %arg8[%c1_21, %c0_22, %c0_23] : memref<2x8x256xf32, #tpu.memory_space<vmem>>, vector<1x8x256xf32>
      %38 = vector.shape_cast %37 : vector<1x8x256xf32> to vector<8x256xf32>
      %39 = arith.mulf %38, %18 : vector<8x256xf32>
      %40 = vector.shape_cast %39 : vector<8x256xf32> to vector<1x8x256xf32>
      %cst_24 = arith.constant dense<0.000000e+00> : vector<1xf32>
      %41 = vector.multi_reduction <add>, %40, %cst_24 [1, 2] : vector<1x8x256xf32> to vector<1xf32>
      %42 = vector.shape_cast %41 : vector<1xf32> to vector<1x1x1xf32>
      %43 = vector.extract %42[0, 0, 0] : f32 from vector<1x1x1xf32>
      %44 = vector.broadcast %43 : f32 to vector<1x8x128xf32>
      %45 = arith.addf %36, %44 : vector<1x8x128xf32>
      %c0_25 = arith.constant 0 : index
      %c0_26 = arith.constant 0 : index
      %c0_27 = arith.constant 0 : index
      %46 = vector.load %arg6[%c0_25, %c0_26, %c0_27] : memref<1x8x128xf32, #tpu.memory_space<vmem>>, vector<1x8x128xf32>
      tpu.vector_store %arg6[%c0_25, %c0_26, %c0_27], %45 {strides = array<i32>} : memref<1x8x128xf32, #tpu.memory_space<vmem>>, vector<1x8x128xf32>,
    } else {
    }
    return
  }
  func.func @transform_0(%arg0: i32, %arg1: i32) -> i32 {
    %c0_i32 = arith.constant 0 : i32
    %c0_i32_0 = arith.constant 0 : i32
    return %c0_i32 : i32
  }
  func.func @transform_1(%arg0: i32, %arg1: i32) -> (i32, i32, i32) {
    %c0_i32 = arith.constant 0 : i32
    %c0_i32_0 = arith.constant 0 : i32
    %c0_i32_1 = arith.constant 0 : i32
    return %c0_i32, %arg0, %c0_i32_0 : i32, i32, i32
  }
  func.func @transform_2(%arg0: i32, %arg1: i32) -> (i32, i32, i32) {
    %c0_i32 = arith.constant 0 : i32
    %c0_i32_0 = arith.constant 0 : i32
    return %arg1, %arg0, %c0_i32 : i32, i32, i32
  }
  func.func @transform_3(%arg0: i32, %arg1: i32) -> (i32, i32) {
    %c0_i32 = arith.constant 0 : i32
    %c0_i32_0 = arith.constant 0 : i32
    %c0_i32_1 = arith.constant 0 : i32
    return %c0_i32, %c0_i32_0 : i32, i32
  }
  func.func @transform_4(%arg0: i32, %arg1: i32) -> (i32, i32, i32) {
    %c0_i32 = arith.constant 0 : i32
    %c0_i32_0 = arith.constant 0 : i32
    %c0_i32_1 = arith.constant 0 : i32
    return %arg0, %c0_i32, %c0_i32_0 : i32, i32, i32
  }
  func.func @transform_5(%arg0: i32, %arg1: i32) -> (i32, i32, i32) {
    %c0_i32 = arith.constant 0 : i32
    %c0_i32_0 = arith.constant 0 : i32
    %c0_i32_1 = arith.constant 0 : i32
    return %arg0, %c0_i32, %c0_i32_0 : i32, i32, i32
  }
}

</mosaic_0001>

<bundles_post_ra>
// kernel: tpu_custom_call.1
= control target key start
LH: loop header
LB: loop body
LE: loop exit
PB: predicated region body
PF: predicated region fallthrough
CT: control target
= control target key end

     0   :  { %s1467_s0 = inlined_call_operand.hbm [shape: f32[4], index: 0, kind: input, shape index: {}]   ;;  %s1468_s1 = inlined_call_operand.hbm [shape: f32[2,16,256], index: 1, kind: input, shape index: {}]   ;;  %s1469_s2 = inlined_call_operand.hbm [shape: f32[3,16,256], index: 2, kind: input, shape index: {}]   ;;  %s1470_s3 = inlined_call_operand.vmem [shape: f32[1,256], index: 3, kind: input, shape index: {}]   ;;  %s1471_s4 = inlined_call_operand.hbm [shape: f32[2,8,128], index: 4, kind: output, shape index: {0}]   ;;  %s1472_s5 = inlined_call_operand.hbm [shape: f32[2,8,256], index: 5, kind: output, shape index: {1}]  }
   0x1   :  { %1484 = sst [smem:[#allocation26_spill]] %s1467_s0 }
   0x2   :  { %1485 = sst [smem:[#allocation27_spill]] %s1468_s1 }
   0x3   :  { %1486 = sst [smem:[#allocation28_spill]] %s1469_s2 }
   0x4   :  { %1487 = sst [smem:[#allocation29_spill]] %s1470_s3 }
   0x5   :  { %1488 = sst [smem:[#allocation30_spill]] %s1471_s4 }
   0x6   :  { %1489 = sst [smem:[#allocation31_spill]] %s1472_s5 }
   0x7   :  { %11 = vsyncpa [#allocation7], 0 }
   0x8   :  { %12 = vsyncpa [#allocation5], 0 }
   0x9   :  { %14 = vsyncpa [#allocation5 + $0x1], 0 }
   0xa   :  { %15 = vsyncpa [#allocation10], 0 }
   0xb   :  { %17 = vsyncpa [#allocation10 + $0x1], 0 }
   0xc   :  { %18 = vsyncpa [#allocation6], 0 }
   0xd   :  { %20 = vsyncpa [#allocation6 + $0x1], 0 }
   0xe   :  { %21 = vsyncpa [#allocation13], 0 }
   0xf   :  { %23 = vsyncpa [#allocation13 + $0x1], 0  ;;  %s1184_s18 = smov 0   ;;  %s1186_s19 = smov 0  }
  0x10   :  { %s1188_s20 = smov 0   ;;  %s1190_s21 = smov 0  }
  0x11   :  { %s1192_s22 = smov 0   ;;  %s1194_s23 = smov 0  }
  0x12   :  { %s1196_s24 = smov 0   ;;  %s1198_s25 = smov 0  }
  0x13   :  { %s1200_s26 = smov 0   ;;  %s1202_s27 = smov 0  }
  0x14   :  { %s1204_s28 = smov 0  }
  0x15 LB: > { %1490 = sst [smem:[#allocation19_spill]] %s1119_s21  ;;  %s726_s29 = sadd.s32 4294967295, %s1147_s28   ;;  %s1147_s28 = sphi %s1204_s28, %s29_s28   ;;  %s1143_s27 = sphi %s1202_s27, %s1531_s27   ;;  %s1139_s26 = sphi %s1200_s26, %s1530_s26   ;;  %s1135_s25 = sphi %s1198_s25, %s1529_s25   ;;  %s1131_s24 = sphi %s1196_s24, %s1528_s24   ;;  %s1127_s23 = sphi %s1194_s23, %s1527_s23   ;;  %s1123_s22 = sphi %s1192_s22, %s1526_s22   ;;  %s1119_s21 = sphi %s1190_s21, %s1525_s21   ;;  %s1115_s20 = sphi %s1188_s20, %s1524_s20   ;;  %s1111_s19 = sphi %s1186_s19, %s1523_s19   ;;  %s1107_s18 = sphi %s1184_s18, %s1522_s18  }
  0x16   : > { %1491 = sst [smem:[#allocation20_spill]] %s1131_s24  ;;  %s727_s30 = sadd.s32 4294967294, %s1147_s28  }
  0x17   : > { %1492 = sst [smem:[#allocation21_spill]] %s1135_s25  ;;  %p76_p0 = scmp.ne.s32.totalorder %s1127_s23, %s1123_s22 }
  0x18   : > { %p77_p1 = scmp.eq.s32.totalorder %s1147_s28, 0  ;;  %p82_p2 = scmp.ne.s32.totalorder %s1123_s22, %s1119_s21 }
  0x19   : > { %p1246_p3 = scmp.eq.s32.totalorder %s726_s29, 0  ;;  %p155_p5 = scmp.eq.s32.totalorder %s726_s29, 5 }
  0x1a   : > { %p1252_p4 = por %p77_p1, %p76_p0  ;;  %p161_p7 = scmp.eq.s32.totalorder %s727_s30, 5 }
  0x1b   : > { %p1258_p6 = por %p1246_p3, %p82_p2  ;;  %p1262_p8 = por %p155_p5, %p76_p0 }
  0x1c   : > { %p728_p9 = scmp.ge.s32.totalorder %s1147_s28, 1  ;;  %p1267_p10 = por %p161_p7, %p82_p2 }
  0x1d   : > { %s1496_s9 = scalar_select %p1262_p8, 1, 0 }
  0x1e   : > { %s1498_s10 = scalar_select %p1267_p10, 1, 0 }
  0x1f   : > { %1497 = sst [smem:[#allocation22_spill]] %s1496_s9  ;;  %p194_p11 = scmp.lt.s32.totalorder %s1147_s28, 7 }
  0x20   : > { %1499 = sst [smem:[#allocation23_spill]] %s1498_s10  ;;  %p796_p0 = scmp.lt.s32.totalorder %s1147_s28, 6 }
  0x21   : > { %s1500_s0 = sld [smem:[#allocation26_spill]]  ;;  %p1275_p12 = pnand %p728_p9, %p194_p11 }
  0x22   : > { %s220_s15 = sand.u32 1, %s1127_s23   ;;  %p1289_p5 = pnand %p796_p0, %p1252_p4 }
  0x23   : > { %p777_p13 = pneg %p1275_p12  ;;  %s1149_s17 = smov [#allocation4]  }
  0x24   : > { %s731_s29 = sshll.u32 %s220_s15, 5  ;;  %s757_s30 = sshll.u32 %s1143_s27, 4 }
  0x25   : > { %p778_p2 = pnand %p777_p13, %p1246_p3  ;;  %s1503_s1 = sld [smem:[#allocation27_spill]] }
  0x26   : > { %s224_s7 = scalar_lea.vmem [#allocation8], %s731_s29  ;;  %s1151_s5 = smov 256  }
  0x27   : > { %s206_s13 = sshll.u32 %s1500_s0, 4  ;;  %s232_s21 = sshll.u32 %s224_s7, 4  ;;  %s207_s13 = int_to_ptr.hbm [resolvable:$true] %s206_s13  ;;  %s233_s21 = int_to_ptr.vmem [resolvable:$true] %s232_s21 }
  0x28   : > { %780 = dma.hbm_to_smem (!%p778_p2), %s207_s13, 16, %s1149_s17, [#allocation7]  }
  0x29   : > { %s221_s13 = scalar_lea.sflag [#allocation5], %s220_s15  ;;  %s1150_s17 = smov 512  }
  0x2a   : > { %s1152_s4 = smov 16   ;;  %s41_s29 = sadd.s32 1, %s1143_s27 }
  0x2b   : > { %s229_s0 = scalar_lea.hbm %s1503_s1, %s757_s30  ;;  %s69_s30 = sadd.s32 1, %s1127_s23 }
  0x2c   : > { %s230_s10 = sshll.u32 %s229_s0, 4  ;;  %s38_s0 = sadd.s32 1, %s1139_s26  ;;  %s231_s10 = int_to_ptr.hbm [resolvable:$true] %s230_s10 }
  0x2d   : > { %784 = dma.hbm_to_vmem [thread:$0]  (!%p1289_p5), %s231_s10, 512, %s233_s21, %s221_s13, %s1150_s17, %s1151_s5, %s1152_s4  }
  0x2e   : > { %p39_p4 = scmp.ge.s32.totalorder %s38_s0, 3  ;;  %s97_s11 = sadd.s32 1, %s1115_s20 }
  0x2f   : > { %p104_p7 = scmp.ne.s32.totalorder %s1115_s20, %s1111_s19  ;;  %p110_p11 = scmp.ne.s32.totalorder %s1111_s19, %s1107_s18 }
  0x30   : > { %s1533_s0 = smov (%p39_p4, %s38_s0), 0  ;;  %s1535_s29 = smov (!%p39_p4, %s41_s29), %s1143_s27 }
  0x31   : > { %1504 = sst [smem:[#allocation24_spill]] %s1533_s0  ;;  %s92_s15 = ssub.s32 %s1139_s26, %s1533_s0 }
  0x32   : > { %p43_p9 = scmp.ge.s32.totalorder %s1535_s29, 2  ;;  %p1314_p13 = por %p104_p7, %p77_p1 }
  0x33   : > { %s242_s5 = sand.u32 1, %s1115_s20   ;;  %p1323_p2 = por %p110_p11, %p1246_p3 }
  0x34   : > { %s1537_s29 = smov (%p43_p9, %s1535_s29), 0  ;;  %s734_s16 = sshll.u32 %s242_s5, 4 }
  0x35   : > { %s1506_s21 = scalar_select %p1323_p2, 1, 0 }
  0x36   : > { %s66_s10 = ssub.s32 %s1143_s27, %s1537_s29  ;;  %s735_s13 = sshll.u32 %s1143_s27, 1 }
  0x37   : > { %1507 = sst [smem:[#allocation25_spill]] %s1506_s21  ;;  %p67_p5 = scmp.eq.s32.totalorder %s66_s10, 0 }
  0x38   : > { %s94_s18 = sor.u32 %s92_s15, %s66_s10  ;;  %s736_s17 = sshll.u32 %s1139_s26, 2 }
  0x39   : > { %p95_p4 = scmp.eq.s32.totalorder %s94_s18, 0  ;;  %s251_s1 = sadd.s32 %s736_s17, %s735_s13 }
  0x3a   : > { %s1330_s12 = scalar_select %p67_p5, %s1127_s23, %s69_s30  }
  0x3b   : > { %s1333_s7 = scalar_select %p95_p4, %s1115_s20, %s97_s11  }
  0x3c   : > { %s246_s0 = scalar_lea.vmem [#allocation9], %s734_s16  ;;  %s737_s25 = sshll.u32 %s251_s1, 3 }
  0x3d   : > { %s257_s9 = sshll.u32 %s246_s0, 4  ;;  %s1508_s2 = sld [smem:[#allocation28_spill]]  ;;  %s258_s9 = int_to_ptr.vmem [resolvable:$true] %s257_s9 }
  0x3e   : > { %p785_p1 = pnand %p796_p0, %p1314_p13  ;;  %s243_s30 = scalar_lea.sflag [#allocation10], %s242_s5 }
  0x41   : > { %266 = sbr.rel (%p1275_p12) target bundleno = 1262 (0x4ee), region = 36 }
  0x43   : > { %s253_s21 = scalar_lea.hbm %s1508_s2, %s737_s25 }
  0x44   : > { %s255_s15 = sshll.u32 %s253_s21, 4  ;;  %s256_s15 = int_to_ptr.hbm [resolvable:$true] %s255_s15 }
  0x45   : > { %787 = dma.hbm_to_vmem [thread:$0]  (!%p785_p1), %s256_s15, 256, %s258_s9, %s243_s30  }
  0x46   : > { %1086 = dma.done.wait (%p1246_p3), [#allocation7], 16  }
  0x47   : > { %1088 = vsyncadd (%p1246_p3), [#allocation7], 4294967280  ;;  %s1351_s1 = sand.u32 1, %s1123_s22  }
  0x48   : > { %s740_s3 = sshll.u32 %s1351_s1, 5  ;;  %s274_s24 = scalar_lea.sflag [#allocation5], %s1351_s1 }
  0x49   : > { %s277_s25 = scalar_lea.vmem [#allocation8], %s740_s3 }
  0x4a   : > { %1090 = dma.done.wait (%p1258_p6), %s274_s24, 512  }
  0x4b   : > { %1092 = vsyncadd (%p1258_p6), %s274_s24, 4294966784  ;;  %s283_s14 = sand.u32 1, %s1111_s19  }
  0x4c   : > { %s1360_s0 = sshll.u32 %s283_s14, 4  ;;  %s284_s6 = scalar_lea.sflag [#allocation10], %s283_s14 }
  0x4d   : > { %s287_s11 = scalar_lea.vmem [#allocation9], %s1360_s0 }
  0x4e   : > { %1094 = dma.done.wait (%p1323_p2), %s284_s6, 256  }
  0x4f   : > { %1096 = vsyncadd (%p1323_p2), %s284_s6, 4294967040 }
  0x50   : > { %293 = sfence }
  0x51   : > { %s742_s4 = sshll.u32 %s1351_s1, 3  ;;  %s743_s5 = sshll.u32 %s1351_s1, 4 }
  0x52   : > { %s1369_s8 = sld [smem:[#allocation4]]  ;;  %s1371_s10 = scalar_lea.vmem [#allocation11], %s742_s4 }
  0x53   : > { %s744_s21 = sld [smem:[#allocation4 + $0x1]]  ;;  %s1373_s16 = scalar_lea.vmem [#allocation12], %s743_s5 }
  0x54   : > { %s1510_s18 = sld [smem:[#allocation20_spill]] }
  0x5a   : > { %p745_p3 = scmp.ne.s32.totalorder %s1510_s18, 0 }
  0x5b   : > { %s1511_s15 = sld [smem:[#allocation29_spill]] (!%p745_p3) }
  0x5c   : > { %331 = sbr.rel (%p745_p3) target bundleno = 383 (0x17f), region = 52 }
  0x61   : > { %v333_v0 = vld [vmem:[%s1511_s15] sm:$0x3]  ;;  %v334_v1 = vld [vmem:[%s277_s25] sm:$0xff]  ;;  %v335_v2 = vld [vmem:[%s277_s25 + $0x8] sm:$0xff]  ;;  %v355_v9 = vstv %s744_s21  ;;  %v1153_v60 = vmov 0.0  }
  0x62   : > { %v336_v3 = vrot.slane %v334_v1, 4  ;;  %v342_v4 = vrot.slane %v335_v2, 4  ;;  %v349_v5 = vperm.slane %v333_v0, 0  ;;  %v350_v6 = vperm.slane %v333_v0, 1  ;;  %v746_v7 = vld [vmem:[%s277_s25 + $0x10] sm:$0xff]  ;;  %v747_v8 = vld [vmem:[%s277_s25 + $0x18] sm:$0xff]  ;;  %332 = vst [vmem:[%s1371_s10] sm:$0xff] %v1153_v60 }
  0x63   : > { %v395_v10 = vrot.slane %v746_v7, 4  ;;  %v401_v11 = vrot.slane %v747_v8, 4 }
  0x64   : > { %v337_v12 = vadd.f32 %v336_v3, %v334_v1  ;;  %v343_v13 = vadd.f32 %v342_v4, %v335_v2  ;;  %v353_v14 = vsub.f32 %v334_v1, %v349_v5  ;;  %v354_v15 = vsub.f32 %v335_v2, %v350_v6 }
  0x65   : > { %v396_v16 = vadd.f32 %v746_v7, %v395_v10  ;;  %v402_v17 = vadd.f32 %v747_v8, %v401_v11  ;;  %v407_v18 = vsub.f32 %v746_v7, %v349_v5  ;;  %v408_v19 = vsub.f32 %v747_v8, %v350_v6 }
  0x66   : > { %v338_v20 = vrot.slane %v337_v12, 2  ;;  %v344_v21 = vrot.slane %v343_v13, 2  ;;  %v356_v22 = vmul.f32 %v355_v9, %v353_v14  ;;  %v357_v23 = vmul.f32 %v355_v9, %v354_v15 }
  0x67   : > { %v397_v24 = vrot.slane %v396_v16, 2  ;;  %v403_v25 = vrot.slane %v402_v17, 2  ;;  %v409_v33 = vmul.f32 %v407_v18, %v355_v9  ;;  %v410_v34 = vmul.f32 %v408_v19, %v355_v9 }
  0x68   : > { %v339_v26 = vadd.f32 %v338_v20, %v337_v12  ;;  %v345_v27 = vadd.f32 %v344_v21, %v343_v13  ;;  %v358_v28 = vmax.f32 %v356_v22, %v357_v23 }
  0x69   : > { %v398_v29 = vadd.f32 %v397_v24, %v396_v16  ;;  %v404_v30 = vadd.f32 %v403_v25, %v402_v17  ;;  %v411_v41 = vmax.f32 %v409_v33, %v410_v34 }
  0x6a   : > { %v340_v31 = vrot.slane %v339_v26, 1  ;;  %v346_v32 = vrot.slane %v345_v27, 1  ;;  %359 = vmax.xlane.f32.xlu0 %v358_v28 }
  0x6b   : > { %v399_v35 = vrot.slane %v398_v29, 1  ;;  %v405_v36 = vrot.slane %v404_v30, 1 }
  0x6c   : > { %v341_v37 = vadd.f32 %v340_v31, %v339_v26  ;;  %v347_v38 = vadd.f32 %v346_v32, %v345_v27 }
  0x6d   : > { %v400_v39 = vadd.f32 %v399_v35, %v398_v29  ;;  %v406_v40 = vadd.f32 %v405_v36, %v404_v30 }
  0x6f   : > { %v444_v42 = vadd.f32 %v400_v39, %v341_v37  ;;  %v445_v43 = vadd.f32 %v406_v40, %v347_v38 }
  0x71   : > { %446 = vst [vmem:[%s1373_s16] sm:$0xff] %v444_v42 }
  0x72   : > { %447 = vst [vmem:[%s1373_s16 + $0x8] sm:$0xff] %v445_v43  ;;  %412 = vmax.xlane.f32.xlu0 %v411_v41 }
  0xdd   : > { %v360_v44 = vpop.xlane.xlu0 %359 }
  0xde   : > { %v361_v45 = vsub.f32 %v356_v22, %v360_v44  ;;  %v362_v46 = vsub.f32 %v357_v23, %v360_v44 }
  0xe0   : > { %v363_v47 = vmul.f32 1.442695, %v361_v45  ;;  %v365_v48 = vmul.f32 1.442695, %v362_v46 }
  0xe2   : > { %892 = vpow2.f32 %v363_v47 }
  0xe3   : > { %894 = vpow2.f32 %v365_v48 }
  0xe5   : > { %v413_v49 = vpop.xlane.xlu0 %412 }
  0xe6   : > { %v414_v50 = vsub.f32 %v409_v33, %v413_v49  ;;  %v415_v51 = vsub.f32 %v410_v34, %v413_v49 }
  0xe8   : > { %v893_v52 = vpop.eup %892  ;;  %v416_v53 = vmul.f32 1.442695, %v414_v50  ;;  %v418_v54 = vmul.f32 1.442695, %v415_v51 }
  0xe9   : > { %v895_v55 = vpop.eup %894 }
  0xea   : > { %896 = vpow2.f32 %v416_v53  ;;  %v367_v56 = vadd.f32 %v895_v55, %v893_v52 }
  0xeb   : > { %898 = vpow2.f32 %v418_v54 }
  0xec   : > { %368 = vadd.xlane.f32.xlu1 %v367_v56 }
  0xf0   : > { %v897_v57 = vpop.eup %896 }
  0xf1   : > { %v899_v58 = vpop.eup %898 }
  0xf2   : > { %v420_v59 = vadd.f32 %v899_v58, %v897_v57 }
  0xf4   : > { %421 = vadd.xlane.f32.xlu1 %v420_v59 }
 0x15f   : > { %v369_v61 = vpop.xlane.xlu1 %368 }
 0x160   : > { %900 = vrcp.f32 %v369_v61  ;;  %v381_v2 = vand.u32 2147483648, %v369_v61  ;;  %v379_v4 = vand.u32 2147483647, %v369_v61  ;;  %vm375_vm1 = vweird.f32 %v369_v61 }
 0x162   : > { %v382_v7 = vor.u32 1.1754944e-38, %v381_v2  ;;  %vm380_vm3 = vcmp.eq.f32.partialorder %v379_v4, 8.507059e+37 }
 0x166   : > { %v901_v62 = vpop.eup %900 }
 0x167   : > { %v371_v63 = vmul.f32 %v901_v62, %v369_v61  ;;  %v422_v0 = vpop.xlane.xlu1 %421  ;;  %vm376_vm0 = vweird.f32 %v901_v62 }
 0x168   : > { %902 = vrcp.f32 %v422_v0  ;;  %vm377_vm2 = vmor %vm375_vm1, %vm376_vm0  ;;  %v434_v14 = vand.u32 2147483648, %v422_v0  ;;  %v432_v16 = vand.u32 2147483647, %v422_v0  ;;  %vm428_vm5 = vweird.f32 %v422_v0 }
 0x169   : > { %v372_v1 = vsub.f32 1.0, %v371_v63 }
 0x16a   : > { %v435_v18 = vor.u32 1.1754944e-38, %v434_v14  ;;  %vm433_vm7 = vcmp.eq.f32.partialorder %v432_v16, 8.507059e+37 }
 0x16b   : > { %v373_v3 = vmul.f32 %v901_v62, %v372_v1 }
 0x16d   : > { %v374_v5 = vadd.f32 %v901_v62, %v373_v3 }
 0x16e   : > { %v903_v6 = vpop.eup %902 }
 0x16f   : > { %v378_v8 = vsel %vm377_vm2, %v901_v62, %v374_v5  ;;  %v424_v9 = vmul.f32 %v903_v6, %v422_v0  ;;  %vm429_vm4 = vweird.f32 %v903_v6 }
 0x170   : > { %v383_v10 = vsel %vm380_vm3, %v382_v7, %v378_v8  ;;  %vm430_vm6 = vmor %vm428_vm5, %vm429_vm4 }
 0x171   : > { %v384_v11 = vmul.f32 %v893_v52, %v383_v10  ;;  %v385_v12 = vmul.f32 %v895_v55, %v383_v10  ;;  %v425_v13 = vsub.f32 1.0, %v424_v9 }
 0x173   : > { %386 = vst [vmem:[#allocation2 + $0x10] sm:$0xff] %v384_v11  ;;  %v426_v15 = vmul.f32 %v903_v6, %v425_v13 }
 0x174   : > { %387 = vst [vmem:[#allocation2] sm:$0xff] %v385_v12 }
 0x175   : > { %v427_v17 = vadd.f32 %v903_v6, %v426_v15 }
 0x177   : > { %v431_v19 = vsel %vm430_vm6, %v903_v6, %v427_v17 }
 0x178   : > { %v436_v20 = vsel %vm433_vm7, %v435_v18, %v431_v19 }
 0x179   : > { %v437_v21 = vmul.f32 %v897_v57, %v436_v20  ;;  %v438_v22 = vmul.f32 %v899_v58, %v436_v20 }
 0x17b   : > { %440 = vst [vmem:[#allocation2 + $0x18] sm:$0xff] %v437_v21  ;;  %v450_v23 = vadd.f32 %v437_v21, %v384_v11  ;;  %v451_v24 = vadd.f32 %v438_v22, %v385_v12 }
 0x17c   : > { %441 = vst [vmem:[#allocation2 + $0x8] sm:$0xff] %v438_v22 }
 0x17d   : > { %452 = vst [vmem:[#allocation3] sm:$0xff] %v450_v23 }
 0x17e   : > { %453 = vst [vmem:[#allocation3 + $0x8] sm:$0xff] %v451_v24 }
 0x17f PF: > { %v454_v25 = vld [vmem:[%s287_s11] sm:$0xff]  ;;  %v455_v26 = vld [vmem:[%s287_s11 + $0x8] sm:$0xff]  ;;  %v456_v27 = vstv %s1369_s8 }
 0x180   : > { %v457_v28 = vmul.f32 %v456_v27, %v454_v25  ;;  %v458_v29 = vmul.f32 %v456_v27, %v455_v26  ;;  %v475_v56 = vld [vmem:[%s1371_s10] sm:$0xff] }
 0x182   : > { %v459_v30 = vmax.f32 %v457_v28, %v458_v29 }
 0x184   : > { %460 = vmax.xlane.f32.xlu0 %v459_v30  ;;  %v476_v42 = vld [vmem:[#allocation3] sm:$0xff] }
 0x185   : > { %v477_v43 = vld [vmem:[#allocation3 + $0x8] sm:$0xff] }
 0x1f7   : > { %v461_v31 = vpop.xlane.xlu0 %460 }
 0x1f8   : > { %v462_v32 = vsub.f32 %v457_v28, %v461_v31  ;;  %v463_v33 = vsub.f32 %v458_v29, %v461_v31 }
 0x1fa   : > { %v464_v34 = vmul.f32 1.442695, %v462_v32  ;;  %v466_v35 = vmul.f32 1.442695, %v463_v33 }
 0x1fc   : > { %904 = vpow2.f32 %v464_v34 }
 0x1fd   : > { %906 = vpow2.f32 %v466_v35 }
 0x202   : > { %v905_v36 = vpop.eup %904 }
 0x203   : > { %v907_v37 = vpop.eup %906 }
 0x204   : > { %v468_v38 = vadd.f32 %v907_v37, %v905_v36 }
 0x206   : > { %469 = vadd.xlane.f32.xlu0 %v468_v38 }
 0x279   : > { %v470_v39 = vpop.xlane.xlu0 %469 }
 0x27a   : > { %908 = vlog2.f32 %v470_v39 }
 0x280   : > { %v909_v40 = vpop.eup %908 }
 0x281   : > { %v472_v41 = vmul.f32 0.6931472, %v909_v40 }
 0x283   : > { %v473_v44 = vsub.f32 %v462_v32, %v472_v41  ;;  %v474_v45 = vsub.f32 %v463_v33, %v472_v41 }
 0x285   : > { %v478_v46 = vmul.f32 %v476_v42, %v473_v44  ;;  %v479_v47 = vmul.f32 %v477_v43, %v474_v45 }
 0x287   : > { %v480_v48 = vadd.f32 %v479_v47, %v478_v46 }
 0x289   : > { %481 = vadd.xlane.f32.xlu1 %v480_v48 }
 0x2fc   : > { %v482_v49 = vpop.xlane.xlu1 %481 }
 0x2fd   : > { %v483_v50 = vrot.slane %v482_v49, 4 }
 0x2ff   : > { %v484_v51 = vadd.f32 %v483_v50, %v482_v49 }
 0x301   : > { %v485_v52 = vrot.slane %v484_v51, 2 }
 0x303   : > { %v486_v53 = vadd.f32 %v485_v52, %v484_v51 }
 0x305   : > { %v487_v54 = vrot.slane %v486_v53, 1 }
 0x307   : > { %v488_v55 = vadd.f32 %v487_v54, %v486_v53 }
 0x309   : > { %759 = vpush %v488_v55 }
 0x33a   : > { %s760_s30 = spop %759 }
 0x33b   : > { %s490_s3 = ssub.f32 0.0, %s760_s30 }
 0x33c   : > { %496 = sbr.rel (%p745_p3) target bundleno = 1020 (0x3fc), region = 56 }
 0x33d   : > { %v491_v57 = vstv %s490_s3 }
 0x33e   : > { %v492_v58 = vadd.f32 %v491_v57, %v475_v56 }
 0x340   : > { %493 = vst [vmem:[%s1371_s10] sm:$0xff] %v492_v58 }
 0x341   : > { %v498_v59 = vld [vmem:[#allocation2 + $0x10] sm:$0xff]  ;;  %v499_v60 = vld [vmem:[#allocation2] sm:$0xff] }
 0x342   : > { %v500_v61 = vmul.f32 %v498_v59, %v473_v44  ;;  %v501_v62 = vmul.f32 %v499_v60, %v474_v45 }
 0x344   : > { %v502_v63 = vadd.f32 %v501_v62, %v500_v61 }
 0x346   : > { %503 = vadd.xlane.f32.xlu0 %v502_v63 }
 0x347   : > { %v497_v7 = vld [vmem:[%s1371_s10] sm:$0xff] }
 0x3b9   : > { %v504_v0 = vpop.xlane.xlu0 %503 }
 0x3ba   : > { %v505_v1 = vrot.slane %v504_v0, 4 }
 0x3bc   : > { %v506_v2 = vadd.f32 %v505_v1, %v504_v0 }
 0x3be   : > { %v507_v3 = vrot.slane %v506_v2, 2 }
 0x3c0   : > { %v508_v4 = vadd.f32 %v507_v3, %v506_v2 }
 0x3c2   : > { %v509_v5 = vrot.slane %v508_v4, 1 }
 0x3c4   : > { %v510_v6 = vadd.f32 %v509_v5, %v508_v4 }
 0x3c6   : > { %761 = vpush %v510_v6 }
 0x3f7   : > { %s762_s25 = spop %761 }
 0x3f8   : > { %v512_v8 = vstv %s762_s25 }
 0x3f9   : > { %v513_v9 = vadd.f32 %v512_v8, %v497_v7 }
 0x3fb   : > { %514 = vst [vmem:[%s1371_s10] sm:$0xff] %v513_v9 }
 0x3fc PF: > { %s1513_s9 = sld [smem:[#allocation20_spill]] }
 0x402   : > { %p749_p6 = scmp.ne.s32.totalorder %s1513_s9, 1 }
 0x404   : > { %518 = sbr.rel (%p749_p6) target bundleno = 1220 (0x4c4), region = 60 }
 0x409   : > { %v521_v10 = vld [vmem:[#allocation2 + $0x18] sm:$0xff]  ;;  %v522_v11 = vld [vmem:[#allocation2 + $0x8] sm:$0xff] }
 0x40a   : > { %v523_v12 = vmul.f32 %v521_v10, %v473_v44  ;;  %v524_v13 = vmul.f32 %v522_v11, %v474_v45  ;;  %v519_v22 = vld [vmem:[%s1371_s10] sm:$0xff] }
 0x40c   : > { %v525_v14 = vadd.f32 %v524_v13, %v523_v12 }
 0x40e   : > { %526 = vadd.xlane.f32.xlu0 %v525_v14 }
 0x481   : > { %v527_v15 = vpop.xlane.xlu0 %526 }
 0x482   : > { %v528_v16 = vrot.slane %v527_v15, 4 }
 0x484   : > { %v529_v17 = vadd.f32 %v528_v16, %v527_v15 }
 0x486   : > { %v530_v18 = vrot.slane %v529_v17, 2 }
 0x488   : > { %v531_v19 = vadd.f32 %v530_v18, %v529_v17 }
 0x48a   : > { %v532_v20 = vrot.slane %v531_v19, 1 }
 0x48c   : > { %v533_v21 = vadd.f32 %v532_v20, %v531_v19 }
 0x48e   : > { %763 = vpush %v533_v21 }
 0x4bf   : > { %s764_s14 = spop %763 }
 0x4c0   : > { %v535_v23 = vstv %s764_s14 }
 0x4c1   : > { %v536_v24 = vadd.f32 %v535_v23, %v519_v22 }
 0x4c3   : > { %537 = vst [vmem:[%s1371_s10] sm:$0xff] %v536_v24 }
 0x4c4 PF: > { %s1514_s0 = sld [smem:[#allocation21_spill]]  ;;  %s556_s18 = sshll.u32 %s1371_s10, 4  ;;  %s557_s18 = int_to_ptr.vmem [resolvable:$true] %s556_s18 }
 0x4c5   : > { %s1516_s8 = sld [smem:[#allocation30_spill]]  ;;  %s539_s17 = scalar_lea.sflag [#allocation6], %s1351_s1 }
 0x4ca   : > { %s752_s11 = sshll.u32 %s1514_s0, 3 }
 0x4cb   : > { %s554_s21 = scalar_lea.hbm %s1516_s8, %s752_s11  ;;  %s1005_s25 = scalar_lea.hbm %s1516_s8, 16 }
 0x4cc   : > { %s558_s13 = sshll.u32 %s554_s21, 4  ;;  %s559_s13 = int_to_ptr.hbm [resolvable:$true] %s558_s13 }
 0x4cd   : > { %s999_s15 = sshra.s32 %s559_s13, 4  ;;  %s1000_s15 = int_to_ptr.hbm [resolvable:$true] %s999_s15 }
 0x4ce   : > { %s1001_s30 = scalar_lea.hbm %s1000_s15, 8  ;;  %p1006_p9 = scmp.lt.s32.totalorder %s1000_s15, %s1516_s8 }
 0x4cf   : > { %p1002_p12 = scmp.ne.s32.totalorder %s1000_s15, %s1001_s30  ;;  %p1007_p11 = scmp.lt.s32.totalorder %s1005_s25, %s1001_s30 }
 0x4d1   : > { %p1003_p0 = pnand %p1002_p12, %p1262_p8  ;;  %p1008_p13 = por %p1007_p11, %p1006_p9 }
 0x4d3   : > { %p1004_p7 = pneg %p1003_p0 }
 0x4d5   : > { %p1009_p2 = pnand %p1008_p13, %p1004_p7 }
 0x4d7   : > { %1012 = shalt.err (!%p1009_p2)
}
 0x4d8   : > { %773 = dma.vmem_to_hbm [thread:$0]  (%p1262_p8), %s557_s18, 128, %s559_s13, %s539_s17  }
 0x4d9   : > { %s758_s10 = sshll.u32 %s1514_s0, 4  ;;  %s571_s11 = sshll.u32 %s1373_s16, 4  ;;  %s572_s11 = int_to_ptr.vmem [resolvable:$true] %s571_s11 }
 0x4da   : > { %s1517_s21 = sld [smem:[#allocation31_spill]]  ;;  %s544_s15 = scalar_lea.sflag [#allocation13], %s1351_s1 }
 0x4e0   : > { %s1518_s3 = smov %s1517_s21  ;;  %s569_s24 = scalar_lea.hbm %s1517_s21, %s758_s10 }
 0x4e1   : > { %s573_s9 = sshll.u32 %s569_s24, 4  ;;  %s1033_s0 = scalar_lea.hbm %s1518_s3, 32  ;;  %s574_s9 = int_to_ptr.hbm [resolvable:$true] %s573_s9 }
 0x4e2   : > { %s1027_s30 = sshra.s32 %s574_s9, 4  ;;  %s1028_s30 = int_to_ptr.hbm [resolvable:$true] %s1027_s30 }
 0x4e3   : > { %s1029_s25 = scalar_lea.hbm %s1028_s30, 16  ;;  %p1034_p3 = scmp.lt.s32.totalorder %s1028_s30, %s1518_s3 }
 0x4e4   : > { %p1030_p5 = scmp.ne.s32.totalorder %s1028_s30, %s1029_s25  ;;  %p1035_p6 = scmp.lt.s32.totalorder %s1033_s0, %s1029_s25 }
 0x4e6   : > { %p1031_p4 = pnand %p1030_p5, %p1262_p8  ;;  %p1036_p12 = por %p1035_p6, %p1034_p3 }
 0x4e8   : > { %p1032_p1 = pneg %p1031_p4 }
 0x4ea   : > { %p1037_p0 = pnand %p1036_p12, %p1032_p1 }
 0x4ec   : > { %1040 = shalt.err (!%p1037_p0)
}
 0x4ed   : > { %774 = dma.vmem_to_hbm [thread:$0]  (%p1262_p8), %s572_s11, 256, %s574_s9, %s544_s15  }
 0x4ee PF: > { %s1519_s1 = sld [smem:[#allocation19_spill]]  ;;  %p798_p7 = scmp.ge.s32.totalorder %s1147_s28, 2 }
 0x4f0   : > { %p789_p9 = pnand %p798_p7, %p1267_p10 }
 0x4f2   : > { %p790_p11 = pneg %p789_p9 }
 0x4f4   : > { %s585_s17 = sand.u32 1, %s1519_s1  }
 0x4f5   : > { %s586_s2 = scalar_lea.sflag [#allocation6], %s585_s17 }
 0x4f6   : > { %1098 = dma.done.wait (%p790_p11), %s586_s2, 128  }
 0x4f7   : > { %1100 = vsyncadd (%p790_p11), %s586_s2, 4294967168  ;;  %s596_s10 = scalar_lea.sflag [#allocation13], %s585_s17 }
 0x4f8   : > { %1102 = dma.done.wait (%p790_p11), %s596_s10, 256  }
 0x4f9   : > { %1104 = vsyncadd (%p790_p11), %s596_s10, 4294967040  ;;  %s29_s28 = sadd.s32 1, %s1147_s28   ;;  %s1521_s6 = sld [smem:[#allocation24_spill]] }
 0x4fa   : > { %p26_p13 = scmp.ge.s32.totalorder %s29_s28, 8   ;;  %s1522_s18 = smov %s1111_s19 }
 0x4fb   : > { %s1523_s19 = smov %s1115_s20  ;;  %s1524_s20 = smov %s1333_s7 }
 0x4fc   : > { %s1525_s21 = smov %s1123_s22  ;;  %s1526_s22 = smov %s1127_s23 }
 0x4fd   : > { %s1527_s23 = smov %s1330_s12  ;;  %s1528_s24 = smov %s1139_s26 }
 0x4fe   : > { %s1529_s25 = smov %s1143_s27  ;;  %s1531_s27 = smov %s1537_s29 }
 0x4ff   : > { %s1530_s26 = smov %s1521_s6  ;;  %28 = sbr.rel (!%p26_p13) target bundleno = 21 (0x15), region = 131 }
 0x504   :  { %602 = vsyncpa [#allocation5], 1 }
 0x505   :  { %604 = vsyncpa [#allocation5 + $0x1], 1 }
 0x506   :  { %605 = vsyncpa [#allocation10], 1 }
 0x507   :  { %607 = vsyncpa [#allocation10 + $0x1], 1 }
 0x508   :  { %608 = vsyncpa [#allocation6], 1 }
 0x509   :  { %610 = vsyncpa [#allocation6 + $0x1], 1 }
 0x50a   :  { %611 = vsyncpa [#allocation13], 1 }
 0x50b   :  { %613 = vsyncpa [#allocation13 + $0x1], 1 }
 0x50c   :  { %614 = vsyncpa [#allocation7], 1 }
 0x50d   :  { %616 = vsyncpa [#allocation7 + $0x1], 1 }

</bundles_post_ra>
